<compile_context>
chip_gen: v6e
topology: v6e:2x2x1
jax: 0.10.0
libtpu: 0.0.40
codegen_flags: <defaults>
</compile_context>

<pallas_src>
import jax
import jax.numpy as jnp
from jax.experimental import pallas as pl
from jax.experimental.pallas import tpu as pltpu

# (cin, cout) per conv layer, conv1..conv8.
_DIMS = [(5, 32), (32, 5), (5, 32), (32, 5), (5, 16), (16, 4), (4, 32), (32, 10)]
_C_IN = _DIMS[0][0]
_C_OUT = _DIMS[-1][1]


def _rup8(n):
    return (n + 7) // 8 * 8


_C_IN_P = _rup8(_C_IN)                              # 8  (input channels padded)
_CA = max(_rup8(co) for _, co in _DIMS)             # 32 (max padded cout)
_KA = max(_rup8(ci) for ci, _ in _DIMS) + 8         # 40 (max augmented contraction)
_TP_DEFAULT = 8192                                  # pixel tile (strip-mined in-kernel)


def _make_kernel(tp, strip):
    nstrips = tp // strip

    def kernel(x_ref, wa_ref, o_ref):
        # x_ref: (1, 8, tp)   wa_ref: (8, 32, 40)   o_ref: (1, 10, tp)
        # Constant ones block, hoisted out of all loops.  Row 0 feeds the bias
        # column of every augmented weight; rows 1..7 hit zero weight columns.
        ones8 = jnp.ones((8, strip), jnp.float32)
        # Fully unrolled strip loop with static slices (free ref views); gives
        # the scheduler a flat body while keeping per-strip live ranges small.
        for s in range(nstrips):
            lo = s * strip
            t = x_ref[0, :, lo:lo + strip]               # (8, strip), pixels on lanes
            for l, (cin, cout) in enumerate(_DIMS):
                cin_p, cout_p = _rup8(cin), _rup8(cout)
                # Per-layer weight load straight from the ref (review item 1).
                w = wa_ref[l, :cout_p, :cin_p + 8]        # (cout_p, cin_p + 8)
                # Sublane-aligned concat (t has a multiple-of-8 row count).
                ta = jnp.concatenate([t, ones8], axis=0)  # (cin_p + 8, strip)
                # One MXU matmul (bias folded in) + one EUP tanh per layer:
                #   t == tanh(0.5 * (W h + b))  ==  2*sigmoid(W h + b) - 1
                t = jnp.tanh(jnp.dot(w, ta, preferred_element_type=jnp.float32))
            # Only the final output pays the 0.5*t + 0.5 affine (10 rows).
            o_ref[0, :, lo:lo + strip] = (0.5 * t[:_C_OUT, :] + 0.5).astype(o_ref.dtype)

    return kernel


def pack_params(params):
    """Pack the 8 conv layers into one (8, 32, 40) augmented weight array.

    Carrying t_l = tanh(0.5*(W_l h_{l-1} + b_l))  (so h_l = 0.5*t_l + 0.5):
      layer 1   : t_1 = tanh((0.5 W_1) x       + 0.5 b_1)
      layer l>1 : t_l = tanh((0.25 W_l) t_{l-1} + 0.5 b_l + 0.25 * rowsum(W_l))
    The (folded) bias is stored in column cin_p of the augmented weight; the
    kernel appends an all-ones row block starting at that row position.
    """
    wa = jnp.zeros((len(_DIMS), _CA, _KA), jnp.float32)
    for l, (cin, cout) in enumerate(_DIMS):
        W = params[f"w{l + 1}"].T          # (cout, cin)
        b = params[f"b{l + 1}"][0]         # (cout,)
        if l == 0:
            Wh, bh = 0.5 * W, 0.5 * b
        else:
            Wh, bh = 0.25 * W, 0.5 * b + 0.25 * jnp.sum(W, axis=1)
        wa = wa.at[l, :cout, :cin].set(Wh)
        wa = wa.at[l, :cout, _rup8(cin)].set(bh)
    return wa


@jax.jit
def run_model(x_nchw, wa):
    """x_nchw: (N, 5, H, W) float32, wa: packed weights from pack_params.
    Returns (N, 10, H, W) float32."""
    N, C, H, W = x_nchw.shape
    assert C == _C_IN
    HW = H * W

    # Pixel tile: multiple of 128, as large as possible (strip-mined in-kernel),
    # but split so the grid has >= 2 steps when N == 1 (keeps v7x's 2nd TC busy).
    hw128 = pl.cdiv(HW, 128) * 128
    tp = min(_TP_DEFAULT, hw128)
    if N == 1 and tp >= hw128 and hw128 >= 256:
        tp = pl.cdiv(hw128, 256) * 128
    strip = 512 if tp % 512 == 0 else (256 if tp % 256 == 0 else 128)
    HWp = pl.cdiv(HW, tp) * tp

    # NCHW is already channel-major; pad channels 5->8 and the ragged pixel tail
    # in a single pad (fused under jit).
    x = jnp.pad(x_nchw.reshape(N, C, HW), ((0, 0), (0, _C_IN_P - C), (0, HWp - HW)))

    flops = 2 * sum(ci * co for ci, co in _DIMS) * N * HWp
    transc = sum(co for _, co in _DIMS) * N * HWp
    bytes_acc = 4 * N * HWp * (_C_IN_P + _C_OUT) + 4 * wa.size

    grid = (N, HWp // tp)
    out = pl.pallas_call(
        _make_kernel(tp, strip),
        out_shape=jax.ShapeDtypeStruct((N, _C_OUT, HWp), jnp.float32),
        grid_spec=pltpu.PrefetchScalarGridSpec(
            num_scalar_prefetch=0,
            grid=grid,
            in_specs=[
                pl.BlockSpec((1, _C_IN_P, tp), lambda n, t: (n, 0, t)),
                pl.BlockSpec((len(_DIMS), _CA, _KA), lambda n, t: (0, 0, 0)),
            ],
            out_specs=pl.BlockSpec((1, _C_OUT, tp), lambda n, t: (n, 0, t)),
        ),
        compiler_params=pltpu.CompilerParams(
            dimension_semantics=("parallel", "parallel")),
        cost_estimate=pl.CostEstimate(
            flops=flops, transcendentals=transc, bytes_accessed=bytes_acc),
    )(x, wa)

    return out[:, :, :HW].reshape(N, _C_OUT, H, W)


def init_params(key):
    """Deterministic weights matching Conv2d(cin, cout, 1) init.
    Stored as (cin, cout) matrices and (1, cout) biases."""
    params = {}
    for idx, (cin, cout) in enumerate(_DIMS, start=1):
        key, kw, kb = jax.random.split(key, 3)
        bound = 1.0 / jnp.sqrt(cin)
        params[f"w{idx}"] = jax.random.uniform(
            kw, (cin, cout), jnp.float32, minval=-bound, maxval=bound)
        params[f"b{idx}"] = jax.random.uniform(
            kb, (1, cout), jnp.float32, minval=-bound, maxval=bound)
    return params


def reference(x_nchw, params):
    """Pure-JAX reference of the forward pass (per-pixel channel MLP)."""
    N, C, H, W = x_nchw.shape
    h = jnp.transpose(x_nchw, (0, 2, 3, 1)).reshape(-1, C)
    for i in range(1, 9):
        h = jax.nn.sigmoid(h @ params[f"w{i}"] + params[f"b{i}"])
    return jnp.transpose(h.reshape(N, H, W, -1), (0, 3, 1, 2))


if __name__ == "__main__":
    key = jax.random.PRNGKey(0)
    key, kp, k1, k2, k3 = jax.random.split(key, 5)

    params = init_params(kp)
    wa = pack_params(params)          # packed once, outside the dispatch path

    tests = [
        (k1, (2, 5, 16, 16)),   # small, 2 grid steps via batch
        (k2, (1, 5, 12, 20)),   # ragged pixel count -> padded tail, tile split
        (k3, (1, 5, 64, 64)),   # exercises in-kernel strip-mining (4 strips)
    ]
    for kx, shape in tests:
        x = jax.random.normal(kx, shape, jnp.float32)
        out = jax.block_until_ready(run_model(x, wa))
        ref = reference(x, params)
        assert out.shape == (shape[0], _C_OUT, shape[2], shape[3]), out.shape
        assert jnp.allclose(out, ref, atol=2e-5, rtol=2e-5), f"mismatch for {shape}"

    print("KERNEL_OK")
</pallas_src>

<mosaic_0001>
module attributes {stable_mosaic.version = 11 : i64} {
  func.func @kernel(%arg0: i32, %arg1: i32, %arg2: memref<1x8x256xf32, #tpu.memory_space<vmem>>, %arg3: memref<8x32x40xf32, #tpu.memory_space<vmem>>, %arg4: memref<1x10x256xf32, #tpu.memory_space<vmem>>) attributes {dimension_semantics = [#tpu.dimension_semantics<parallel>, #tpu.dimension_semantics<parallel>], iteration_bounds = array<i64: 2, 1>, scalar_prefetch = 0 : i64, scratch_operands = 0 : i64, tpu.core_type = #tpu.core_type<tc>, window_params = [{transform_indices = @transform_0, window_bounds = array<i64: 1, 8, 256>}, {pipeline_mode = #tpu.pipeline_mode<synchronous>, transform_indices = @transform_1, window_bounds = array<i64: 8, 32, 40>}, {transform_indices = @transform_2, window_bounds = array<i64: 1, 10, 256>}]} {
    %cst = arith.constant 1.000000e+00 : f32
    %0 = vector.broadcast %cst : f32 to vector<8x256xf32>
    %c0 = arith.constant 0 : index
    %c0_0 = arith.constant 0 : index
    %c0_1 = arith.constant 0 : index
    %1 = vector.load %arg2[%c0, %c0_0, %c0_1] : memref<1x8x256xf32, #tpu.memory_space<vmem>>, vector<1x8x256xf32>
    %2 = vector.shape_cast %1 : vector<1x8x256xf32> to vector<8x256xf32>
    %c0_2 = arith.constant 0 : index
    %c0_3 = arith.constant 0 : index
    %c0_4 = arith.constant 0 : index
    %3 = vector.load %arg3[%c0_2, %c0_3, %c0_4] : memref<8x32x40xf32, #tpu.memory_space<vmem>>, vector<1x32x16xf32>
    %4 = vector.shape_cast %3 : vector<1x32x16xf32> to vector<32x16xf32>
    %5 = tpu.concatenate %2, %0 in 0 : vector<8x256xf32>, vector<8x256xf32> -> vector<16x256xf32>
    %cst_5 = arith.constant dense<0.000000e+00> : vector<32x256xf32>
    %6 = tpu.matmul %4, %5, %cst_5 {dimension_numbers = #tpu.dot_dimension_numbers<[1], [0], [0], [1], [0, 0, 1, 1], [], []>} : vector<32x16xf32>, vector<16x256xf32>, vector<32x256xf32> -> vector<32x256xf32>
    %7 = math.tanh %6 : vector<32x256xf32>
    %c1 = arith.constant 1 : index
    %c0_6 = arith.constant 0 : index
    %c0_7 = arith.constant 0 : index
    %8 = vector.load %arg3[%c1, %c0_6, %c0_7] : memref<8x32x40xf32, #tpu.memory_space<vmem>>, vector<1x8x40xf32>
    %9 = vector.shape_cast %8 : vector<1x8x40xf32> to vector<8x40xf32>
    %10 = tpu.concatenate %7, %0 in 0 : vector<32x256xf32>, vector<8x256xf32> -> vector<40x256xf32>
    %cst_8 = arith.constant dense<0.000000e+00> : vector<8x256xf32>
    %11 = tpu.matmul %9, %10, %cst_8 {dimension_numbers = #tpu.dot_dimension_numbers<[1], [0], [0], [1], [0, 0, 1, 1], [], []>} : vector<8x40xf32>, vector<40x256xf32>, vector<8x256xf32> -> vector<8x256xf32>
    %12 = math.tanh %11 : vector<8x256xf32>
    %c2 = arith.constant 2 : index
    %c0_9 = arith.constant 0 : index
    %c0_10 = arith.constant 0 : index
    %13 = vector.load %arg3[%c2, %c0_9, %c0_10] : memref<8x32x40xf32, #tpu.memory_space<vmem>>, vector<1x32x16xf32>
    %14 = vector.shape_cast %13 : vector<1x32x16xf32> to vector<32x16xf32>
    %15 = tpu.concatenate %12, %0 in 0 : vector<8x256xf32>, vector<8x256xf32> -> vector<16x256xf32>
    %cst_11 = arith.constant dense<0.000000e+00> : vector<32x256xf32>
    %16 = tpu.matmul %14, %15, %cst_11 {dimension_numbers = #tpu.dot_dimension_numbers<[1], [0], [0], [1], [0, 0, 1, 1], [], []>} : vector<32x16xf32>, vector<16x256xf32>, vector<32x256xf32> -> vector<32x256xf32>
    %17 = math.tanh %16 : vector<32x256xf32>
    %c3 = arith.constant 3 : index
    %c0_12 = arith.constant 0 : index
    %c0_13 = arith.constant 0 : index
    %18 = vector.load %arg3[%c3, %c0_12, %c0_13] : memref<8x32x40xf32, #tpu.memory_space<vmem>>, vector<1x8x40xf32>
    %19 = vector.shape_cast %18 : vector<1x8x40xf32> to vector<8x40xf32>
    %20 = tpu.concatenate %17, %0 in 0 : vector<32x256xf32>, vector<8x256xf32> -> vector<40x256xf32>
    %cst_14 = arith.constant dense<0.000000e+00> : vector<8x256xf32>
    %21 = tpu.matmul %19, %20, %cst_14 {dimension_numbers = #tpu.dot_dimension_numbers<[1], [0], [0], [1], [0, 0, 1, 1], [], []>} : vector<8x40xf32>, vector<40x256xf32>, vector<8x256xf32> -> vector<8x256xf32>
    %22 = math.tanh %21 : vector<8x256xf32>
    %c4 = arith.constant 4 : index
    %c0_15 = arith.constant 0 : index
    %c0_16 = arith.constant 0 : index
    %23 = vector.load %arg3[%c4, %c0_15, %c0_16] : memref<8x32x40xf32, #tpu.memory_space<vmem>>, vector<1x16x16xf32>
    %24 = vector.shape_cast %23 : vector<1x16x16xf32> to vector<16x16xf32>
    %25 = tpu.concatenate %22, %0 in 0 : vector<8x256xf32>, vector<8x256xf32> -> vector<16x256xf32>
    %cst_17 = arith.constant dense<0.000000e+00> : vector<16x256xf32>
    %26 = tpu.matmul %24, %25, %cst_17 {dimension_numbers = #tpu.dot_dimension_numbers<[1], [0], [0], [1], [0, 0, 1, 1], [], []>} : vector<16x16xf32>, vector<16x256xf32>, vector<16x256xf32> -> vector<16x256xf32>
    %27 = math.tanh %26 : vector<16x256xf32>
    %c5 = arith.constant 5 : index
    %c0_18 = arith.constant 0 : index
    %c0_19 = arith.constant 0 : index
    %28 = vector.load %arg3[%c5, %c0_18, %c0_19] : memref<8x32x40xf32, #tpu.memory_space<vmem>>, vector<1x8x24xf32>
    %29 = vector.shape_cast %28 : vector<1x8x24xf32> to vector<8x24xf32>
    %30 = tpu.concatenate %27, %0 in 0 : vector<16x256xf32>, vector<8x256xf32> -> vector<24x256xf32>
    %cst_20 = arith.constant dense<0.000000e+00> : vector<8x256xf32>
    %31 = tpu.matmul %29, %30, %cst_20 {dimension_numbers = #tpu.dot_dimension_numbers<[1], [0], [0], [1], [0, 0, 1, 1], [], []>} : vector<8x24xf32>, vector<24x256xf32>, vector<8x256xf32> -> vector<8x256xf32>
    %32 = math.tanh %31 : vector<8x256xf32>
    %c6 = arith.constant 6 : index
    %c0_21 = arith.constant 0 : index
    %c0_22 = arith.constant 0 : index
    %33 = vector.load %arg3[%c6, %c0_21, %c0_22] : memref<8x32x40xf32, #tpu.memory_space<vmem>>, vector<1x32x16xf32>
    %34 = vector.shape_cast %33 : vector<1x32x16xf32> to vector<32x16xf32>
    %35 = tpu.concatenate %32, %0 in 0 : vector<8x256xf32>, vector<8x256xf32> -> vector<16x256xf32>
    %cst_23 = arith.constant dense<0.000000e+00> : vector<32x256xf32>
    %36 = tpu.matmul %34, %35, %cst_23 {dimension_numbers = #tpu.dot_dimension_numbers<[1], [0], [0], [1], [0, 0, 1, 1], [], []>} : vector<32x16xf32>, vector<16x256xf32>, vector<32x256xf32> -> vector<32x256xf32>
    %37 = math.tanh %36 : vector<32x256xf32>
    %c7 = arith.constant 7 : index
    %c0_24 = arith.constant 0 : index
    %c0_25 = arith.constant 0 : index
    %38 = vector.load %arg3[%c7, %c0_24, %c0_25] : memref<8x32x40xf32, #tpu.memory_space<vmem>>, vector<1x16x40xf32>
    %39 = vector.shape_cast %38 : vector<1x16x40xf32> to vector<16x40xf32>
    %40 = tpu.concatenate %37, %0 in 0 : vector<32x256xf32>, vector<8x256xf32> -> vector<40x256xf32>
    %cst_26 = arith.constant dense<0.000000e+00> : vector<16x256xf32>
    %41 = tpu.matmul %39, %40, %cst_26 {dimension_numbers = #tpu.dot_dimension_numbers<[1], [0], [0], [1], [0, 0, 1, 1], [], []>} : vector<16x40xf32>, vector<40x256xf32>, vector<16x256xf32> -> vector<16x256xf32>
    %42 = math.tanh %41 : vector<16x256xf32>
    %43 = vector.extract_strided_slice %42 {offsets = [0, 0], sizes = [10, 256], strides = [1, 1]} : vector<16x256xf32> to vector<10x256xf32>
    %cst_27 = arith.constant 5.000000e-01 : f32
    %44 = vector.broadcast %cst_27 : f32 to vector<10x256xf32>
    %45 = arith.mulf %44, %43 : vector<10x256xf32>
    %cst_28 = arith.constant 5.000000e-01 : f32
    %46 = vector.broadcast %cst_28 : f32 to vector<10x256xf32>
    %47 = arith.addf %45, %46 : vector<10x256xf32>
    %c0_29 = arith.constant 0 : index
    %c0_30 = arith.constant 0 : index
    %c0_31 = arith.constant 0 : index
    %48 = vector.load %arg4[%c0_29, %c0_30, %c0_31] : memref<1x10x256xf32, #tpu.memory_space<vmem>>, vector<1x10x256xf32>
    %49 = vector.shape_cast %48 : vector<1x10x256xf32> to vector<10x256xf32>
    %50 = vector.shape_cast %47 : vector<10x256xf32> to vector<1x10x256xf32>
    tpu.vector_store %arg4[%c0_29, %c0_30, %c0_31], %50 {strides = array<i32>} : memref<1x10x256xf32, #tpu.memory_space<vmem>>, vector<1x10x256xf32>,
    return
  }
  func.func @transform_0(%arg0: i32, %arg1: i32) -> (i32, i32, i32) {
    %c0_i32 = arith.constant 0 : i32
    %c0_i32_0 = arith.constant 0 : i32
    return %arg0, %c0_i32, %arg1 : i32, i32, i32
  }
  func.func @transform_1(%arg0: i32, %arg1: i32) -> (i32, i32, i32) {
    %c0_i32 = arith.constant 0 : i32
    %c0_i32_0 = arith.constant 0 : i32
    %c0_i32_1 = arith.constant 0 : i32
    %c0_i32_2 = arith.constant 0 : i32
    return %c0_i32, %c0_i32_0, %c0_i32_1 : i32, i32, i32
  }
  func.func @transform_2(%arg0: i32, %arg1: i32) -> (i32, i32, i32) {
    %c0_i32 = arith.constant 0 : i32
    %c0_i32_0 = arith.constant 0 : i32
    return %arg0, %c0_i32, %arg1 : i32, i32, i32
  }
}

</mosaic_0001>

<bundles_post_ra>
// kernel: run_model.1
= control target key start
LH: loop header
LB: loop body
LE: loop exit
PB: predicated region body
PF: predicated region fallthrough
CT: control target
= control target key end

     0   :  { %s1232_s9 = smov 0   ;;  %s1234_s10 = smov 0   ;;  %s1379_s0 = inlined_call_operand.vmem [shape: f32[2,8,256], index: 0, kind: input, shape index: {}]   ;;  %s1380_s1 = inlined_call_operand.vmem [shape: f32[8,32,40], index: 1, kind: input, shape index: {}]   ;;  %s1381_s2 = inlined_call_operand.vmem [shape: f32[2,10,256], index: 2, kind: output, shape index: {}]  }
   0x1   :  { %s1236_s11 = smov 0  }
   0x2 LB: > { %s24_s12 = sadd.s32 1, %s1209_s10  ;;  %p1046_p0 = scmp.ge.s32.totalorder %s1213_s11, 1  ;;  %s1213_s11 = sphi %s1236_s11, %s12_s11   ;;  %s1209_s10 = sphi %s1234_s10, %s1383_s10   ;;  %s1205_s9 = sphi %s1232_s9, %s1382_s9  }
   0x3   : > { %p26_p1 = scmp.ge.s32.totalorder %s24_s12, 2  ;;  %p133_p2 = scmp.lt.s32.totalorder %s1213_s11, 3 }
   0x5   : > { %s1385_s12 = smov (%p26_p1, %s24_s12), 0  ;;  %p134_p3 = pnand %p1046_p0, %p133_p2 }
   0x6   : > { %p164_p4 = scmp.lt.s32.totalorder (!%p134_p3), %s1205_s9, 1 }
   0x7   : > { %137 = sbr.rel (%p134_p3) target bundleno = 1773 (0x6ed), region = 28 }
   0xc   : > { %v1215_v0 = vmov 1.0   ;;  %v1216_v1 = vmov 0.0   ;;  %s1387_s9 = smov (!%p164_p4, %s1205_s9), 1  ;;  %v185_v4 = vld [vmem:[%s1380_s1] sm:$0xff]  ;;  %vm189_vm0 = vcmask 130048   ;;  %v186_v5 = vld [vmem:[%s1380_s1 + $0x8] sm:$0xff] }
   0xd   : > { %230 = vmatprep.subr.mxu0 %v1215_v0  ;;  %266 = vmatprep.mubr.f32.mxu0 %v1216_v1  ;;  %s1087_s13 = sshll.u32 %s1387_s9, 4  ;;  %v187_v6 = vld [vmem:[%s1380_s1 + $0x10] sm:$0xff]  ;;  %v188_v7 = vld [vmem:[%s1380_s1 + $0x18] sm:$0xff]  ;;  %v1055_v23 = vld [vmem:[%s1380_s1 + $0x20] sm:$0xff]  ;;  %vm301_vm1 = vcmask 326656   ;;  %vm662_vm2 = vcmask 195584  }
   0xe   : > { %231 = vmatpush1.msra.mxu0 %v1215_v0  ;;  %327 = vmatprep.subr.mxu1 %v1215_v0  ;;  %s171_s16 = scalar_lea.vmem %s1379_s0, %s1087_s13  ;;  %v1057_v28 = vld [vmem:[%s1380_s1 + $0x40] sm:$0xff]  ;;  %v1058_v30 = vld [vmem:[%s1380_s1 + $0x48] sm:$0xff]  ;;  %v1059_v31 = vld [vmem:[%s1380_s1 + $0x50] sm:$0xff]  ;;  %s1088_s3 = sshll.u32 %s1387_s9, 5 }
   0xf   : > { %328 = vmatpush1.msra.mxu1 %v1215_v0  ;;  %369 = vmatprep.mubr.f32.mxu1 %v1216_v1  ;;  %v184_v2 = vld [vmem:[%s171_s16 + $0x8] sm:$0xff]  ;;  %v183_v3 = vld [vmem:[%s171_s16] sm:$0xff]  ;;  %v1060_v32 = vld [vmem:[%s1380_s1 + $0x58] sm:$0xff]  ;;  %s181_s6 = scalar_lea.vmem %s1381_s2, %s1088_s3 }
  0x10   : > { %232 = vmatprep.subr.mxu0 %v184_v2  ;;  %v1065_v48 = vld [vmem:[%s1380_s1 + $0x60] sm:$0xff]  ;;  %v1068_v55 = vld [vmem:[%s1380_s1 + $0x88] sm:$0xff] }
  0x11   : > { %233 = vmatpush1.msra.mxu0 %v183_v3  ;;  %v1067_v53 = vld [vmem:[%s1380_s1 + $0x80] sm:$0xff] }
  0x12   : > { %1051 = vmatmul.mubr.msk.f32.vlgmr.msra.gmra.mxu0 %vm189_vm0, %v185_v4  ;;  %519 = vmatprep.subr.mxu0 %v1215_v0  ;;  %v1071_v63 = vld [vmem:[%s1380_s1 + $0xa0] sm:$0xff] }
  0x13   : > { %272 = vmatprep.mubr.f32.mxu0 %v1216_v1  ;;  %520 = vmatpush1.msra.mxu0 %v1215_v0 }
  0x16   : > { %1052 = vmatmul.mubr.msk.f32.gmra.mxu0 %vm189_vm0, %v186_v5 }
  0x17   : > { %278 = vmatprep.mubr.f32.mxu0 %v1216_v1 }
  0x1a   : > { %1053 = vmatmul.mubr.msk.f32.gmra.mxu0 %vm189_vm0, %v187_v6  ;;  %v1073_v6 = vld [vmem:[%s1380_s1 + $0xc0] sm:$0xff] }
  0x1b   : > { %284 = vmatprep.mubr.f32.mxu0 %v1216_v1 }
  0x1e   : > { %1054 = vmatmul.mubr.msk.f32.gmra.mxu0 %vm189_vm0, %v188_v7 }
  0x1f   : > { %561 = vmatprep.mubr.f32.mxu0 %v1216_v1 }
  0xd2   : > { %v268_v8 = vpop.f32.mrf.mxu0 }
  0xd4   : > { %v270_v9 = vpop.f32.mrf.mxu0 }
  0xd6   : > { %v274_v10 = vpop.f32.mrf.mxu0 }
  0xd8   : > { %v276_v11 = vpop.f32.mrf.mxu0 }
  0xda   : > { %v280_v12 = vpop.f32.mrf.mxu0 }
  0xdc   : > { %v282_v13 = vpop.f32.mrf.mxu0 }
  0xde   : > { %v286_v14 = vpop.f32.mrf.mxu0 }
  0xe0   : > { %v288_v15 = vpop.f32.mrf.mxu0 }
  0xe1   : > { %1115 = vtanh.f32 %v288_v15 }
  0xe2   : > { %1117 = vtanh.f32 %v286_v14 }
  0xe3   : > { %1119 = vtanh.f32 %v282_v13 }
  0xe4   : > { %1121 = vtanh.f32 %v280_v12 }
  0xe5   : > { %1123 = vtanh.f32 %v276_v11 }
  0xe6   : > { %1125 = vtanh.f32 %v274_v10 }
  0xe7   : > { %1127 = vtanh.f32 %v270_v9  ;;  %v1076_v9 = vld [vmem:[%s1380_s1 + $0xd8] sm:$0xff] }
  0xe8   : > { %1129 = vtanh.f32 %v268_v8  ;;  %v1075_v8 = vld [vmem:[%s1380_s1 + $0xd0] sm:$0xff] }
  0xee   : > { %v1116_v16 = vpop.eup %1115 }
  0xef   : > { %v1118_v17 = vpop.eup %1117  ;;  %329 = vmatprep.subr.mxu1 %v1116_v16 }
  0xf0   : > { %v1120_v18 = vpop.eup %1119  ;;  %330 = vmatpush1.msra.mxu1 %v1118_v17 }
  0xf1   : > { %v1122_v19 = vpop.eup %1121  ;;  %331 = vmatprep.subr.mxu1 %v1120_v18 }
  0xf2   : > { %v1124_v20 = vpop.eup %1123  ;;  %332 = vmatpush1.msra.mxu1 %v1122_v19 }
  0xf3   : > { %v1126_v21 = vpop.eup %1125  ;;  %333 = vmatprep.subr.mxu1 %v1124_v20 }
  0xf4   : > { %v1128_v22 = vpop.eup %1127  ;;  %334 = vmatpush1.msra.mxu1 %v1126_v21 }
  0xf5   : > { %v1130_v24 = vpop.eup %1129  ;;  %335 = vmatprep.subr.mxu1 %v1128_v22 }
  0xf6   : > { %336 = vmatpush1.msra.mxu1 %v1130_v24 }
  0xf7   : > { %1056 = vmatmul.mubr.msk.f32.vlgmr.msra.gmra.mxu1 %vm301_vm1, %v1055_v23  ;;  %423 = vmatprep.subr.mxu1 %v1215_v0 }
  0xf8   : > { %424 = vmatpush1.msra.mxu1 %v1215_v0  ;;  %459 = vmatprep.mubr.f32.mxu1 %v1216_v1 }
 0x1b7   : > { %v371_v25 = vpop.f32.mrf.mxu1 }
 0x1b9   : > { %v373_v26 = vpop.f32.mrf.mxu1 }
 0x1ba   : > { %1131 = vtanh.f32 %v373_v26 }
 0x1bb   : > { %1133 = vtanh.f32 %v371_v25  ;;  %v1081_v25 = vld [vmem:[%s1380_s1 + $0xe0] sm:$0xff] }
 0x1c7   : > { %v1132_v27 = vpop.eup %1131 }
 0x1c8   : > { %v1134_v29 = vpop.eup %1133  ;;  %425 = vmatprep.subr.mxu1 %v1132_v27  ;;  %v1082_v27 = vld [vmem:[%s1380_s1 + $0xe8] sm:$0xff] }
 0x1c9   : > { %426 = vmatpush1.msra.mxu1 %v1134_v29 }
 0x1ca   : > { %1061 = vmatmul.mubr.msk.f32.vlgmr.msra.gmra.mxu1 %vm189_vm0, %v1057_v28  ;;  %692 = vmatprep.subr.mxu1 %v1215_v0 }
 0x1cb   : > { %465 = vmatprep.mubr.f32.mxu1 %v1216_v1  ;;  %693 = vmatpush1.msra.mxu1 %v1215_v0 }
 0x1ce   : > { %1062 = vmatmul.mubr.msk.f32.gmra.mxu1 %vm189_vm0, %v1058_v30 }
 0x1cf   : > { %471 = vmatprep.mubr.f32.mxu1 %v1216_v1 }
 0x1d2   : > { %1063 = vmatmul.mubr.msk.f32.gmra.mxu1 %vm189_vm0, %v1059_v31 }
 0x1d3   : > { %477 = vmatprep.mubr.f32.mxu1 %v1216_v1 }
 0x1d6   : > { %1064 = vmatmul.mubr.msk.f32.gmra.mxu1 %vm189_vm0, %v1060_v32 }
 0x1d7   : > { %730 = vmatprep.mubr.f32.mxu1 %v1216_v1 }
 0x28a   : > { %v461_v33 = vpop.f32.mrf.mxu1 }
 0x28c   : > { %v463_v34 = vpop.f32.mrf.mxu1 }
 0x28e   : > { %v467_v35 = vpop.f32.mrf.mxu1 }
 0x290   : > { %v469_v36 = vpop.f32.mrf.mxu1 }
 0x292   : > { %v473_v37 = vpop.f32.mrf.mxu1 }
 0x294   : > { %v475_v38 = vpop.f32.mrf.mxu1 }
 0x296   : > { %v479_v39 = vpop.f32.mrf.mxu1 }
 0x298   : > { %v481_v40 = vpop.f32.mrf.mxu1 }
 0x299   : > { %1135 = vtanh.f32 %v481_v40 }
 0x29a   : > { %1137 = vtanh.f32 %v479_v39 }
 0x29b   : > { %1139 = vtanh.f32 %v475_v38 }
 0x29c   : > { %1141 = vtanh.f32 %v473_v37 }
 0x29d   : > { %1143 = vtanh.f32 %v469_v36 }
 0x29e   : > { %1145 = vtanh.f32 %v467_v35 }
 0x29f   : > { %1147 = vtanh.f32 %v463_v34 }
 0x2a0   : > { %1149 = vtanh.f32 %v461_v33 }
 0x2a6   : > { %v1136_v41 = vpop.eup %1135 }
 0x2a7   : > { %v1138_v42 = vpop.eup %1137  ;;  %521 = vmatprep.subr.mxu0 %v1136_v41 }
 0x2a8   : > { %v1140_v43 = vpop.eup %1139  ;;  %522 = vmatpush1.msra.mxu0 %v1138_v42 }
 0x2a9   : > { %v1142_v44 = vpop.eup %1141  ;;  %523 = vmatprep.subr.mxu0 %v1140_v43 }
 0x2aa   : > { %v1144_v45 = vpop.eup %1143  ;;  %524 = vmatpush1.msra.mxu0 %v1142_v44 }
 0x2ab   : > { %v1146_v46 = vpop.eup %1145  ;;  %525 = vmatprep.subr.mxu0 %v1144_v45 }
 0x2ac   : > { %v1148_v47 = vpop.eup %1147  ;;  %526 = vmatpush1.msra.mxu0 %v1146_v46 }
 0x2ad   : > { %v1150_v49 = vpop.eup %1149  ;;  %527 = vmatprep.subr.mxu0 %v1148_v47 }
 0x2ae   : > { %528 = vmatpush1.msra.mxu0 %v1150_v49 }
 0x2af   : > { %1066 = vmatmul.mubr.msk.f32.vlgmr.msra.gmra.mxu0 %vm301_vm1, %v1065_v48  ;;  %607 = vmatprep.subr.mxu0 %v1215_v0 }
 0x2b0   : > { %608 = vmatpush1.msra.mxu0 %v1215_v0  ;;  %643 = vmatprep.mubr.f32.mxu0 %v1216_v1 }
 0x36f   : > { %v563_v50 = vpop.f32.mrf.mxu0 }
 0x371   : > { %v565_v51 = vpop.f32.mrf.mxu0 }
 0x372   : > { %1151 = vtanh.f32 %v565_v51 }
 0x373   : > { %1153 = vtanh.f32 %v563_v50 }
 0x37f   : > { %v1152_v52 = vpop.eup %1151 }
 0x380   : > { %v1154_v54 = vpop.eup %1153  ;;  %609 = vmatprep.subr.mxu0 %v1152_v52 }
 0x381   : > { %610 = vmatpush1.msra.mxu0 %v1154_v54 }
 0x382   : > { %1069 = vmatmul.mubr.msk.f32.vlgmr.msra.gmra.mxu0 %vm189_vm0, %v1067_v53  ;;  %784 = vmatprep.subr.mxu0 %v1215_v0 }
 0x383   : > { %649 = vmatprep.mubr.f32.mxu0 %v1216_v1  ;;  %785 = vmatpush1.msra.mxu0 %v1215_v0 }
 0x386   : > { %1070 = vmatmul.mubr.msk.f32.gmra.mxu0 %vm189_vm0, %v1068_v55 }
 0x387   : > { %820 = vmatprep.mubr.f32.mxu0 %v1216_v1 }
 0x442   : > { %v645_v56 = vpop.f32.mrf.mxu0 }
 0x444   : > { %v647_v57 = vpop.f32.mrf.mxu0 }
 0x446   : > { %v651_v58 = vpop.f32.mrf.mxu0 }
 0x448   : > { %v653_v59 = vpop.f32.mrf.mxu0 }
 0x449   : > { %1155 = vtanh.f32 %v653_v59 }
 0x44a   : > { %1157 = vtanh.f32 %v651_v58 }
 0x44b   : > { %1159 = vtanh.f32 %v647_v57 }
 0x44c   : > { %1161 = vtanh.f32 %v645_v56 }
 0x456   : > { %v1156_v60 = vpop.eup %1155 }
 0x457   : > { %v1158_v61 = vpop.eup %1157  ;;  %694 = vmatprep.subr.mxu1 %v1156_v60 }
 0x458   : > { %v1160_v62 = vpop.eup %1159  ;;  %695 = vmatpush1.msra.mxu1 %v1158_v61 }
 0x459   : > { %v1162_v2 = vpop.eup %1161  ;;  %696 = vmatprep.subr.mxu1 %v1160_v62 }
 0x45a   : > { %697 = vmatpush1.msra.mxu1 %v1162_v2 }
 0x45b   : > { %1072 = vmatmul.mubr.msk.f32.vlgmr.msra.gmra.mxu1 %vm662_vm2, %v1071_v63  ;;  %884 = vmatprep.subr.mxu1 %v1215_v0 }
 0x45c   : > { %885 = vmatpush1.msra.mxu1 %v1215_v0  ;;  %926 = vmatprep.mubr.f32.mxu1 %v1216_v1  ;;  %v1074_v0 = vld [vmem:[%s1380_s1 + $0xc8] sm:$0xff] }
 0x51b   : > { %v732_v3 = vpop.f32.mrf.mxu1 }
 0x51d   : > { %v734_v4 = vpop.f32.mrf.mxu1 }
 0x51e   : > { %1163 = vtanh.f32 %v734_v4 }
 0x51f   : > { %1165 = vtanh.f32 %v732_v3 }
 0x52b   : > { %v1164_v5 = vpop.eup %1163 }
 0x52c   : > { %v1166_v7 = vpop.eup %1165  ;;  %786 = vmatprep.subr.mxu0 %v1164_v5 }
 0x52d   : > { %787 = vmatpush1.msra.mxu0 %v1166_v7 }
 0x52e   : > { %1077 = vmatmul.mubr.msk.f32.vlgmr.msra.gmra.mxu0 %vm189_vm0, %v1073_v6 }
 0x52f   : > { %826 = vmatprep.mubr.f32.mxu0 %v1216_v1 }
 0x532   : > { %1078 = vmatmul.mubr.msk.f32.gmra.mxu0 %vm189_vm0, %v1074_v0 }
 0x533   : > { %832 = vmatprep.mubr.f32.mxu0 %v1216_v1 }
 0x536   : > { %1079 = vmatmul.mubr.msk.f32.gmra.mxu0 %vm189_vm0, %v1075_v8 }
 0x537   : > { %838 = vmatprep.mubr.f32.mxu0 %v1216_v1 }
 0x53a   : > { %1080 = vmatmul.mubr.msk.f32.gmra.mxu0 %vm189_vm0, %v1076_v9 }
 0x5ee   : > { %v822_v10 = vpop.f32.mrf.mxu0 }
 0x5f0   : > { %v824_v11 = vpop.f32.mrf.mxu0 }
 0x5f2   : > { %v828_v12 = vpop.f32.mrf.mxu0 }
 0x5f4   : > { %v830_v13 = vpop.f32.mrf.mxu0 }
 0x5f6   : > { %v834_v14 = vpop.f32.mrf.mxu0 }
 0x5f8   : > { %v836_v15 = vpop.f32.mrf.mxu0 }
 0x5fa   : > { %v840_v16 = vpop.f32.mrf.mxu0 }
 0x5fc   : > { %v842_v17 = vpop.f32.mrf.mxu0 }
 0x5fd   : > { %1167 = vtanh.f32 %v842_v17 }
 0x5fe   : > { %1169 = vtanh.f32 %v840_v16 }
 0x5ff   : > { %1171 = vtanh.f32 %v836_v15 }
 0x600   : > { %1173 = vtanh.f32 %v834_v14 }
 0x601   : > { %1175 = vtanh.f32 %v830_v13 }
 0x602   : > { %1177 = vtanh.f32 %v828_v12 }
 0x603   : > { %1179 = vtanh.f32 %v824_v11 }
 0x604   : > { %1181 = vtanh.f32 %v822_v10 }
 0x60a   : > { %v1168_v18 = vpop.eup %1167 }
 0x60b   : > { %v1170_v19 = vpop.eup %1169  ;;  %886 = vmatprep.subr.mxu1 %v1168_v18 }
 0x60c   : > { %v1172_v20 = vpop.eup %1171  ;;  %887 = vmatpush1.msra.mxu1 %v1170_v19 }
 0x60d   : > { %v1174_v21 = vpop.eup %1173  ;;  %888 = vmatprep.subr.mxu1 %v1172_v20 }
 0x60e   : > { %v1176_v22 = vpop.eup %1175  ;;  %889 = vmatpush1.msra.mxu1 %v1174_v21 }
 0x60f   : > { %v1178_v23 = vpop.eup %1177  ;;  %890 = vmatprep.subr.mxu1 %v1176_v22 }
 0x610   : > { %v1180_v24 = vpop.eup %1179  ;;  %891 = vmatpush1.msra.mxu1 %v1178_v23 }
 0x611   : > { %v1182_v26 = vpop.eup %1181  ;;  %892 = vmatprep.subr.mxu1 %v1180_v24 }
 0x612   : > { %893 = vmatpush1.msra.mxu1 %v1182_v26 }
 0x613   : > { %1083 = vmatmul.mubr.msk.f32.vlgmr.msra.gmra.mxu1 %vm301_vm1, %v1081_v25 }
 0x614   : > { %932 = vmatprep.mubr.f32.mxu1 %v1216_v1 }
 0x617   : > { %1084 = vmatmul.mubr.msk.f32.gmra.mxu1 %vm301_vm1, %v1082_v27 }
 0x6d3   : > { %v928_v28 = vpop.f32.mrf.mxu1 }
 0x6d4   : > { %1183 = vtanh.f32 %v928_v28 }
 0x6d5   : > { %v930_v29 = vpop.f32.mrf.mxu1 }
 0x6d6   : > { %1185 = vtanh.f32 %v930_v29 }
 0x6d7   : > { %v934_v30 = vpop.f32.mrf.mxu1 }
 0x6d8   : > { %1187 = vtanh.f32 %v934_v30 }
 0x6d9   : > { %v936_v31 = vpop.f32.mrf.mxu1 }
 0x6da   : > { %1189 = vtanh.f32 %v936_v31 }
 0x6e1   : > { %v1184_v32 = vpop.eup %1183 }
 0x6e2   : > { %v943_v33 = vmul.f32 0.5, %v1184_v32 }
 0x6e3   : > { %v1186_v34 = vpop.eup %1185 }
 0x6e4   : > { %v947_v1 = vadd.f32 0.5, %v943_v33  ;;  %v944_v35 = vmul.f32 0.5, %v1186_v34 }
 0x6e5   : > { %v1188_v36 = vpop.eup %1187 }
 0x6e6   : > { %951 = vst [vmem:[%s181_s6] sm:$0xff] %v947_v1  ;;  %v948_v37 = vadd.f32 0.5, %v944_v35  ;;  %v945_v38 = vmul.f32 0.5, %v1188_v36 }
 0x6e7   : > { %v1190_v39 = vpop.eup %1189 }
 0x6e8   : > { %952 = vst [vmem:[%s181_s6 + $0x8] sm:$0xff] %v948_v37  ;;  %v949_v40 = vadd.f32 0.5, %v945_v38  ;;  %v946_v41 = vmul.f32 0.5, %v1190_v39 }
 0x6ea   : > { %953 = vst [vmem:[%s181_s6 + $0x10] sm:$0x3] %v949_v40  ;;  %v950_v42 = vadd.f32 0.5, %v946_v41 }
 0x6ec   : > { %954 = vst [vmem:[%s181_s6 + $0x18] sm:$0x3] %v950_v42 }
 0x6ed PF: > { %s12_s11 = sadd.s32 1, %s1213_s11   ;;  %s1382_s9 = smov %s1209_s10 }
 0x6ee   : > { %p9_p5 = scmp.ge.s32.totalorder %s12_s11, 4   ;;  %s1383_s10 = smov %s1385_s12 }
 0x6f0   :  { %11 = sbr.rel (!%p9_p5) target bundleno = 2 (0x2), region = 65 }

</bundles_post_ra>
